<compile_context>
chip_gen: v5e
topology: v5e:2x2
jax: 0.10.0
libtpu: 0.0.40
codegen_flags: <defaults>
</compile_context>

<pallas_src>
import jax
import jax.numpy as jnp
from jax.experimental import pallas as pl
from jax.experimental.pallas import tpu as pltpu

EPS = 1e-5
NEG_SLOPE = 0.01
LANE = 128                      # all feature dims are zero-padded to 128 lanes
NUM_LAYERS = 4
INPUT_SIZE = 8                  # forward() does x.view(-1, 8)

# Static row offsets of each layer's weight inside the 2-D weight slab.
# Layer 1 keeps only its 8 real fan-in rows; layers 2..4 use full 128 rows.
W_OFF = (0, INPUT_SIZE, INPUT_SIZE + LANE, INPUT_SIZE + 2 * LANE)   # (0, 8, 136, 264)
W_ROWS_TOTAL = INPUT_SIZE + 3 * LANE                                # 392 (multiple of 8)


def _mlp_kernel(x_ref, w_ref, v_ref, out_ref):
    """Whole net for one BatchNorm group: 4 MXU matmuls + LeakyReLU + BN + sigmoid.

    x_ref  : (NB, 8)        f32  one complete BN batch (batch on sublanes)
    w_ref  : (392, 128)     f32  packed weights, (in, out) layout, zero padded
    v_ref  : (12, 128)      f32  rows [3i, 3i+1, 3i+2] = bias, gamma, beta of layer i
    out_ref: (NB, 1)        f32  real output column, stored directly
    """

    def leaky(h):
        return jnp.where(h >= 0, h, NEG_SLOPE * h)

    def batch_norm(h, gamma, beta):
        # Centered (numerically safe) biased variance over the batch (sublane) axis.
        inv_n = 1.0 / h.shape[0]
        mean = jnp.sum(h, axis=0, keepdims=True) * inv_n
        d = h - mean
        var = jnp.sum(d * d, axis=0, keepdims=True) * inv_n
        scale = gamma * jax.lax.rsqrt(var + EPS)       # fold gamma into rsqrt row
        return d * scale + beta                        # one fma per element

    x = x_ref[...]          # (NB, 8)
    vec = v_ref[...]        # (12, 128): one load, static row slices below

    # ---- layer 1: (NB, 8) @ (8, 128); ref-side slice loads only 8 sublanes ----
    h = jnp.dot(x, w_ref[W_OFF[0]:W_OFF[1], :],
                preferred_element_type=jnp.float32) + vec[0:1, :]
    h = batch_norm(leaky(h), vec[1:2, :], vec[2:3, :])

    # ---- layer 2: (NB, 128) @ (128, 128); zero-padded K rows/lanes are inert ----
    h = jnp.dot(h, w_ref[W_OFF[1]:W_OFF[2], :],
                preferred_element_type=jnp.float32) + vec[3:4, :]
    h = batch_norm(leaky(h), vec[4:5, :], vec[5:6, :])

    # ---- layer 3 ----
    h = jnp.dot(h, w_ref[W_OFF[2]:W_OFF[3], :],
                preferred_element_type=jnp.float32) + vec[6:7, :]
    h = batch_norm(leaky(h), vec[7:8, :], vec[8:9, :])

    # ---- layer 4 (no LeakyReLU before its BatchNorm, matching the module) ----
    h = jnp.dot(h, w_ref[W_OFF[3]:W_ROWS_TOTAL, :],
                preferred_element_type=jnp.float32) + vec[9:10, :]
    h = batch_norm(h, vec[10:11, :], vec[11:12, :])

    # Store only the live column: (NB, 1) output, no lane-dense padding, no
    # follow-on XLA slice op.
    out_ref[...] = jax.nn.sigmoid(h[:, 0:1])


def solution_model_forward(x, w_slab, vec_slab):
    """Forward pass.

    x may be (NB, 8)  -> one BatchNorm batch, returns (NB, 1)
         or (G, NB, 8) -> G independent BN batches in one pallas_call
                          (grid over G, dimension_semantics=("parallel",)),
                          returns (G, NB, 1).
    """
    squeeze = x.ndim == 2
    if squeeze:
        x = x[None]
    g, nb, f = x.shape

    out = pl.pallas_call(
        _mlp_kernel,
        out_shape=jax.ShapeDtypeStruct((g, nb, 1), jnp.float32),
        grid=(g,),
        in_specs=[
            pl.BlockSpec((None, nb, f), lambda i: (i, 0, 0)),            # per-batch tile
            pl.BlockSpec((W_ROWS_TOTAL, LANE), lambda i: (0, 0)),        # resident slab
            pl.BlockSpec((3 * NUM_LAYERS, LANE), lambda i: (0, 0)),      # resident slab
        ],
        out_specs=pl.BlockSpec((None, nb, 1), lambda i: (i, 0, 0)),
        compiler_params=pltpu.CompilerParams(
            dimension_semantics=("parallel",)),       # v7x: shard batches across TCs
    )(x, w_slab, vec_slab)

    return out[0] if squeeze else out


def init_params(key, input_size, hidden_size, output_size):
    """Deterministic PyTorch-style init: U(-1/sqrt(fan_in), 1/sqrt(fan_in))."""
    dims = [input_size] + list(hidden_size) + [output_size]
    params = {}
    for i in range(NUM_LAYERS):
        fan_in, fan_out = dims[i], dims[i + 1]
        key, kw, kb = jax.random.split(key, 3)
        bound = 1.0 / jnp.sqrt(fan_in)
        # stored as (in, out) so the kernel computes x @ W
        params[f"w{i+1}"] = jax.random.uniform(
            kw, (fan_in, fan_out), jnp.float32, -bound, bound)
        params[f"b{i+1}"] = jax.random.uniform(
            kb, (1, fan_out), jnp.float32, -bound, bound)
        # BatchNorm affine params (default init: gamma=1, beta=0)
        params[f"g{i+1}"] = jnp.ones((1, fan_out), jnp.float32)
        params[f"be{i+1}"] = jnp.zeros((1, fan_out), jnp.float32)
    return params


def pack_params(params, dims):
    """Pack 16 small tensors into two zero-padded slabs (2 input DMAs for params).

    Weight slab is 2-D: layer 1 occupies only its real 8 fan-in rows, so its
    120 all-zero padding rows are never transferred.
    """
    w_slab = jnp.zeros((W_ROWS_TOTAL, LANE), jnp.float32)
    vec_slab = jnp.zeros((3 * NUM_LAYERS, LANE), jnp.float32)
    row_off = list(W_OFF)
    for i in range(NUM_LAYERS):
        fi, fo = dims[i], dims[i + 1]
        w_slab = w_slab.at[row_off[i]:row_off[i] + fi, :fo].set(params[f"w{i+1}"])
        vec_slab = vec_slab.at[3 * i + 0, :fo].set(params[f"b{i+1}"].reshape(-1))
        vec_slab = vec_slab.at[3 * i + 1, :fo].set(params[f"g{i+1}"].reshape(-1))
        vec_slab = vec_slab.at[3 * i + 2, :fo].set(params[f"be{i+1}"].reshape(-1))
    return w_slab, vec_slab


def reference_forward(x, params):
    """Pure-JAX reference (PyTorch semantics: centered biased variance, eps=1e-5)."""
    def leaky(h):
        return jnp.where(h >= 0, h, NEG_SLOPE * h)

    def bn(h, g, b):
        m = jnp.mean(h, axis=0, keepdims=True)
        v = jnp.mean((h - m) ** 2, axis=0, keepdims=True)
        return (h - m) / jnp.sqrt(v + EPS) * g + b

    h = bn(leaky(x @ params["w1"] + params["b1"]), params["g1"], params["be1"])
    h = bn(leaky(h @ params["w2"] + params["b2"]), params["g2"], params["be2"])
    h = bn(leaky(h @ params["w3"] + params["b3"]), params["g3"], params["be3"])
    h = bn(h @ params["w4"] + params["b4"], params["g4"], params["be4"])
    return jax.nn.sigmoid(h)


if __name__ == "__main__":
    HIDDEN_SIZE = (32, 64, 32)
    OUTPUT_SIZE = 1
    BATCH = 64                 # rows per BatchNorm group (8 binary "votes" each)
    GROUPS = 4                 # independent BN batches processed in one pallas_call

    key = jax.random.PRNGKey(0)
    key, kx = jax.random.split(key)
    # Binary vote inputs, like the original problem.
    x = jax.random.bernoulli(
        kx, 0.5, (GROUPS, BATCH, INPUT_SIZE)).astype(jnp.float32)

    params = init_params(jax.random.PRNGKey(0), INPUT_SIZE, HIDDEN_SIZE, OUTPUT_SIZE)
    dims = [INPUT_SIZE] + list(HIDDEN_SIZE) + [OUTPUT_SIZE]
    w_slab, vec_slab = pack_params(params, dims)

    # Batched path: GROUPS independent BN batches, one kernel launch.
    out = solution_model_forward(x, w_slab, vec_slab)
    out = jax.block_until_ready(out)

    ref = jax.vmap(lambda xb: reference_forward(xb, params))(x)
    assert out.shape == (GROUPS, BATCH, OUTPUT_SIZE), out.shape
    max_diff = float(jnp.max(jnp.abs(out - ref)))
    assert max_diff < 1e-4, f"max abs diff {max_diff}"

    # Single-batch path (matches the module's x.view(-1, 8) call signature).
    out1 = jax.block_until_ready(solution_model_forward(x[0], w_slab, vec_slab))
    assert out1.shape == (BATCH, OUTPUT_SIZE), out1.shape
    max_diff1 = float(jnp.max(jnp.abs(out1 - ref[0])))
    assert max_diff1 < 1e-4, f"max abs diff (single batch) {max_diff1}"

    print("KERNEL_OK")
</pallas_src>

<mosaic_0001>
module attributes {stable_mosaic.version = 11 : i64} {
  func.func @_mlp_kernel(%arg0: i32, %arg1: memref<1x64x8xf32, #tpu.memory_space<vmem>>, %arg2: memref<392x128xf32, #tpu.memory_space<vmem>>, %arg3: memref<12x128xf32, #tpu.memory_space<vmem>>, %arg4: memref<1x64x1xf32, #tpu.memory_space<vmem>>) attributes {dimension_semantics = [#tpu.dimension_semantics<parallel>], iteration_bounds = array<i64: 4>, scalar_prefetch = 0 : i64, scratch_operands = 0 : i64, tpu.core_type = #tpu.core_type<tc>, window_params = [{transform_indices = @transform_0, window_bounds = array<i64: 1, 64, 8>}, {pipeline_mode = #tpu.pipeline_mode<synchronous>, transform_indices = @transform_1, window_bounds = array<i64: 392, 128>}, {pipeline_mode = #tpu.pipeline_mode<synchronous>, transform_indices = @transform_2, window_bounds = array<i64: 12, 128>}, {transform_indices = @transform_3, window_bounds = array<i64: 1, 64, 1>}]} {
    %c0 = arith.constant 0 : index
    %c0_0 = arith.constant 0 : index
    %c0_1 = arith.constant 0 : index
    %0 = vector.load %arg1[%c0, %c0_0, %c0_1] : memref<1x64x8xf32, #tpu.memory_space<vmem>>, vector<1x64x8xf32>
    %1 = vector.shape_cast %0 : vector<1x64x8xf32> to vector<64x8xf32>
    %c0_2 = arith.constant 0 : index
    %c0_3 = arith.constant 0 : index
    %2 = vector.load %arg3[%c0_2, %c0_3] : memref<12x128xf32, #tpu.memory_space<vmem>>, vector<12x128xf32>
    %c0_4 = arith.constant 0 : index
    %c0_5 = arith.constant 0 : index
    %3 = vector.load %arg2[%c0_4, %c0_5] : memref<392x128xf32, #tpu.memory_space<vmem>>, vector<8x128xf32>
    %cst = arith.constant dense<0.000000e+00> : vector<64x128xf32>
    %4 = tpu.matmul %1, %3, %cst {dimension_numbers = #tpu.dot_dimension_numbers<[1], [0], [0], [1], [0, 0, 1, 1], [], []>} : vector<64x8xf32>, vector<8x128xf32>, vector<64x128xf32> -> vector<64x128xf32>
    %5 = vector.extract_strided_slice %2 {offsets = [0, 0], sizes = [1, 128], strides = [1, 1]} : vector<12x128xf32> to vector<1x128xf32>
    %6 = vector.broadcast %5 : vector<1x128xf32> to vector<64x128xf32>
    %7 = arith.addf %4, %6 : vector<64x128xf32>
    %cst_6 = arith.constant 0.000000e+00 : f32
    %8 = vector.broadcast %cst_6 : f32 to vector<64x128xf32>
    %9 = arith.cmpf oge, %7, %8 : vector<64x128xf32>
    %cst_7 = arith.constant 0.00999999977 : f32
    %10 = vector.broadcast %cst_7 : f32 to vector<64x128xf32>
    %11 = arith.mulf %10, %7 : vector<64x128xf32>
    %12 = arith.select %9, %7, %11 : vector<64x128xi1>, vector<64x128xf32>
    %13 = vector.extract_strided_slice %2 {offsets = [1, 0], sizes = [1, 128], strides = [1, 1]} : vector<12x128xf32> to vector<1x128xf32>
    %14 = vector.extract_strided_slice %2 {offsets = [2, 0], sizes = [1, 128], strides = [1, 1]} : vector<12x128xf32> to vector<1x128xf32>
    %cst_8 = arith.constant dense<0.000000e+00> : vector<128xf32>
    %15 = vector.multi_reduction <add>, %12, %cst_8 [0] : vector<64x128xf32> to vector<128xf32>
    %16 = vector.shape_cast %15 : vector<128xf32> to vector<1x128xf32>
    %cst_9 = arith.constant 1.562500e-02 : f32
    %17 = vector.broadcast %cst_9 : f32 to vector<1x128xf32>
    %18 = arith.mulf %16, %17 : vector<1x128xf32>
    %19 = vector.broadcast %18 : vector<1x128xf32> to vector<64x128xf32>
    %20 = arith.subf %12, %19 : vector<64x128xf32>
    %21 = arith.mulf %20, %20 : vector<64x128xf32>
    %cst_10 = arith.constant dense<0.000000e+00> : vector<128xf32>
    %22 = vector.multi_reduction <add>, %21, %cst_10 [0] : vector<64x128xf32> to vector<128xf32>
    %23 = vector.shape_cast %22 : vector<128xf32> to vector<1x128xf32>
    %cst_11 = arith.constant 1.562500e-02 : f32
    %24 = vector.broadcast %cst_11 : f32 to vector<1x128xf32>
    %25 = arith.mulf %23, %24 : vector<1x128xf32>
    %cst_12 = arith.constant 9.99999974E-6 : f32
    %26 = vector.broadcast %cst_12 : f32 to vector<1x128xf32>
    %27 = arith.addf %25, %26 : vector<1x128xf32>
    %28 = math.rsqrt %27 : vector<1x128xf32>
    %29 = arith.mulf %13, %28 : vector<1x128xf32>
    %30 = vector.broadcast %29 : vector<1x128xf32> to vector<64x128xf32>
    %31 = arith.mulf %20, %30 : vector<64x128xf32>
    %32 = vector.broadcast %14 : vector<1x128xf32> to vector<64x128xf32>
    %33 = arith.addf %31, %32 : vector<64x128xf32>
    %c8 = arith.constant 8 : index
    %c0_13 = arith.constant 0 : index
    %34 = vector.load %arg2[%c8, %c0_13] : memref<392x128xf32, #tpu.memory_space<vmem>>, vector<128x128xf32>
    %cst_14 = arith.constant dense<0.000000e+00> : vector<64x128xf32>
    %35 = tpu.matmul %33, %34, %cst_14 {dimension_numbers = #tpu.dot_dimension_numbers<[1], [0], [0], [1], [0, 0, 1, 1], [], []>} : vector<64x128xf32>, vector<128x128xf32>, vector<64x128xf32> -> vector<64x128xf32>
    %36 = vector.extract_strided_slice %2 {offsets = [3, 0], sizes = [1, 128], strides = [1, 1]} : vector<12x128xf32> to vector<1x128xf32>
    %37 = vector.broadcast %36 : vector<1x128xf32> to vector<64x128xf32>
    %38 = arith.addf %35, %37 : vector<64x128xf32>
    %cst_15 = arith.constant 0.000000e+00 : f32
    %39 = vector.broadcast %cst_15 : f32 to vector<64x128xf32>
    %40 = arith.cmpf oge, %38, %39 : vector<64x128xf32>
    %cst_16 = arith.constant 0.00999999977 : f32
    %41 = vector.broadcast %cst_16 : f32 to vector<64x128xf32>
    %42 = arith.mulf %41, %38 : vector<64x128xf32>
    %43 = arith.select %40, %38, %42 : vector<64x128xi1>, vector<64x128xf32>
    %44 = vector.extract_strided_slice %2 {offsets = [4, 0], sizes = [1, 128], strides = [1, 1]} : vector<12x128xf32> to vector<1x128xf32>
    %45 = vector.extract_strided_slice %2 {offsets = [5, 0], sizes = [1, 128], strides = [1, 1]} : vector<12x128xf32> to vector<1x128xf32>
    %cst_17 = arith.constant dense<0.000000e+00> : vector<128xf32>
    %46 = vector.multi_reduction <add>, %43, %cst_17 [0] : vector<64x128xf32> to vector<128xf32>
    %47 = vector.shape_cast %46 : vector<128xf32> to vector<1x128xf32>
    %cst_18 = arith.constant 1.562500e-02 : f32
    %48 = vector.broadcast %cst_18 : f32 to vector<1x128xf32>
    %49 = arith.mulf %47, %48 : vector<1x128xf32>
    %50 = vector.broadcast %49 : vector<1x128xf32> to vector<64x128xf32>
    %51 = arith.subf %43, %50 : vector<64x128xf32>
    %52 = arith.mulf %51, %51 : vector<64x128xf32>
    %cst_19 = arith.constant dense<0.000000e+00> : vector<128xf32>
    %53 = vector.multi_reduction <add>, %52, %cst_19 [0] : vector<64x128xf32> to vector<128xf32>
    %54 = vector.shape_cast %53 : vector<128xf32> to vector<1x128xf32>
    %cst_20 = arith.constant 1.562500e-02 : f32
    %55 = vector.broadcast %cst_20 : f32 to vector<1x128xf32>
    %56 = arith.mulf %54, %55 : vector<1x128xf32>
    %cst_21 = arith.constant 9.99999974E-6 : f32
    %57 = vector.broadcast %cst_21 : f32 to vector<1x128xf32>
    %58 = arith.addf %56, %57 : vector<1x128xf32>
    %59 = math.rsqrt %58 : vector<1x128xf32>
    %60 = arith.mulf %44, %59 : vector<1x128xf32>
    %61 = vector.broadcast %60 : vector<1x128xf32> to vector<64x128xf32>
    %62 = arith.mulf %51, %61 : vector<64x128xf32>
    %63 = vector.broadcast %45 : vector<1x128xf32> to vector<64x128xf32>
    %64 = arith.addf %62, %63 : vector<64x128xf32>
    %c136 = arith.constant 136 : index
    %c0_22 = arith.constant 0 : index
    %65 = vector.load %arg2[%c136, %c0_22] : memref<392x128xf32, #tpu.memory_space<vmem>>, vector<128x128xf32>
    %cst_23 = arith.constant dense<0.000000e+00> : vector<64x128xf32>
    %66 = tpu.matmul %64, %65, %cst_23 {dimension_numbers = #tpu.dot_dimension_numbers<[1], [0], [0], [1], [0, 0, 1, 1], [], []>} : vector<64x128xf32>, vector<128x128xf32>, vector<64x128xf32> -> vector<64x128xf32>
    %67 = vector.extract_strided_slice %2 {offsets = [6, 0], sizes = [1, 128], strides = [1, 1]} : vector<12x128xf32> to vector<1x128xf32>
    %68 = vector.broadcast %67 : vector<1x128xf32> to vector<64x128xf32>
    %69 = arith.addf %66, %68 : vector<64x128xf32>
    %cst_24 = arith.constant 0.000000e+00 : f32
    %70 = vector.broadcast %cst_24 : f32 to vector<64x128xf32>
    %71 = arith.cmpf oge, %69, %70 : vector<64x128xf32>
    %cst_25 = arith.constant 0.00999999977 : f32
    %72 = vector.broadcast %cst_25 : f32 to vector<64x128xf32>
    %73 = arith.mulf %72, %69 : vector<64x128xf32>
    %74 = arith.select %71, %69, %73 : vector<64x128xi1>, vector<64x128xf32>
    %75 = vector.extract_strided_slice %2 {offsets = [7, 0], sizes = [1, 128], strides = [1, 1]} : vector<12x128xf32> to vector<1x128xf32>
    %76 = vector.extract_strided_slice %2 {offsets = [8, 0], sizes = [1, 128], strides = [1, 1]} : vector<12x128xf32> to vector<1x128xf32>
    %cst_26 = arith.constant dense<0.000000e+00> : vector<128xf32>
    %77 = vector.multi_reduction <add>, %74, %cst_26 [0] : vector<64x128xf32> to vector<128xf32>
    %78 = vector.shape_cast %77 : vector<128xf32> to vector<1x128xf32>
    %cst_27 = arith.constant 1.562500e-02 : f32
    %79 = vector.broadcast %cst_27 : f32 to vector<1x128xf32>
    %80 = arith.mulf %78, %79 : vector<1x128xf32>
    %81 = vector.broadcast %80 : vector<1x128xf32> to vector<64x128xf32>
    %82 = arith.subf %74, %81 : vector<64x128xf32>
    %83 = arith.mulf %82, %82 : vector<64x128xf32>
    %cst_28 = arith.constant dense<0.000000e+00> : vector<128xf32>
    %84 = vector.multi_reduction <add>, %83, %cst_28 [0] : vector<64x128xf32> to vector<128xf32>
    %85 = vector.shape_cast %84 : vector<128xf32> to vector<1x128xf32>
    %cst_29 = arith.constant 1.562500e-02 : f32
    %86 = vector.broadcast %cst_29 : f32 to vector<1x128xf32>
    %87 = arith.mulf %85, %86 : vector<1x128xf32>
    %cst_30 = arith.constant 9.99999974E-6 : f32
    %88 = vector.broadcast %cst_30 : f32 to vector<1x128xf32>
    %89 = arith.addf %87, %88 : vector<1x128xf32>
    %90 = math.rsqrt %89 : vector<1x128xf32>
    %91 = arith.mulf %75, %90 : vector<1x128xf32>
    %92 = vector.broadcast %91 : vector<1x128xf32> to vector<64x128xf32>
    %93 = arith.mulf %82, %92 : vector<64x128xf32>
    %94 = vector.broadcast %76 : vector<1x128xf32> to vector<64x128xf32>
    %95 = arith.addf %93, %94 : vector<64x128xf32>
    %c264 = arith.constant 264 : index
    %c0_31 = arith.constant 0 : index
    %96 = vector.load %arg2[%c264, %c0_31] : memref<392x128xf32, #tpu.memory_space<vmem>>, vector<128x128xf32>
    %cst_32 = arith.constant dense<0.000000e+00> : vector<64x128xf32>
    %97 = tpu.matmul %95, %96, %cst_32 {dimension_numbers = #tpu.dot_dimension_numbers<[1], [0], [0], [1], [0, 0, 1, 1], [], []>} : vector<64x128xf32>, vector<128x128xf32>, vector<64x128xf32> -> vector<64x128xf32>
    %98 = vector.extract_strided_slice %2 {offsets = [9, 0], sizes = [1, 128], strides = [1, 1]} : vector<12x128xf32> to vector<1x128xf32>
    %99 = vector.broadcast %98 : vector<1x128xf32> to vector<64x128xf32>
    %100 = arith.addf %97, %99 : vector<64x128xf32>
    %101 = vector.extract_strided_slice %2 {offsets = [10, 0], sizes = [1, 128], strides = [1, 1]} : vector<12x128xf32> to vector<1x128xf32>
    %102 = vector.extract_strided_slice %2 {offsets = [11, 0], sizes = [1, 128], strides = [1, 1]} : vector<12x128xf32> to vector<1x128xf32>
    %cst_33 = arith.constant dense<0.000000e+00> : vector<128xf32>
    %103 = vector.multi_reduction <add>, %100, %cst_33 [0] : vector<64x128xf32> to vector<128xf32>
    %104 = vector.shape_cast %103 : vector<128xf32> to vector<1x128xf32>
    %cst_34 = arith.constant 1.562500e-02 : f32
    %105 = vector.broadcast %cst_34 : f32 to vector<1x128xf32>
    %106 = arith.mulf %104, %105 : vector<1x128xf32>
    %107 = vector.broadcast %106 : vector<1x128xf32> to vector<64x128xf32>
    %108 = arith.subf %100, %107 : vector<64x128xf32>
    %109 = arith.mulf %108, %108 : vector<64x128xf32>
    %cst_35 = arith.constant dense<0.000000e+00> : vector<128xf32>
    %110 = vector.multi_reduction <add>, %109, %cst_35 [0] : vector<64x128xf32> to vector<128xf32>
    %111 = vector.shape_cast %110 : vector<128xf32> to vector<1x128xf32>
    %cst_36 = arith.constant 1.562500e-02 : f32
    %112 = vector.broadcast %cst_36 : f32 to vector<1x128xf32>
    %113 = arith.mulf %111, %112 : vector<1x128xf32>
    %cst_37 = arith.constant 9.99999974E-6 : f32
    %114 = vector.broadcast %cst_37 : f32 to vector<1x128xf32>
    %115 = arith.addf %113, %114 : vector<1x128xf32>
    %116 = math.rsqrt %115 : vector<1x128xf32>
    %117 = arith.mulf %101, %116 : vector<1x128xf32>
    %118 = vector.broadcast %117 : vector<1x128xf32> to vector<64x128xf32>
    %119 = arith.mulf %108, %118 : vector<64x128xf32>
    %120 = vector.broadcast %102 : vector<1x128xf32> to vector<64x128xf32>
    %121 = arith.addf %119, %120 : vector<64x128xf32>
    %122 = vector.extract_strided_slice %121 {offsets = [0, 0], sizes = [64, 1], strides = [1, 1]} : vector<64x128xf32> to vector<64x1xf32>
    %123 = arith.negf %122 : vector<64x1xf32>
    %124 = math.exp %123 : vector<64x1xf32>
    %cst_38 = arith.constant 1.000000e+00 : f32
    %125 = vector.broadcast %cst_38 : f32 to vector<64x1xf32>
    %126 = arith.addf %125, %124 : vector<64x1xf32>
    %127 = arith.divf %125, %126 : vector<64x1xf32>
    %c0_39 = arith.constant 0 : index
    %c0_40 = arith.constant 0 : index
    %c0_41 = arith.constant 0 : index
    %128 = vector.load %arg4[%c0_39, %c0_40, %c0_41] : memref<1x64x1xf32, #tpu.memory_space<vmem>>, vector<1x64x1xf32>
    %129 = vector.shape_cast %128 : vector<1x64x1xf32> to vector<64x1xf32>
    %130 = vector.shape_cast %127 : vector<64x1xf32> to vector<1x64x1xf32>
    tpu.vector_store %arg4[%c0_39, %c0_40, %c0_41], %130 {strides = array<i32>} : memref<1x64x1xf32, #tpu.memory_space<vmem>>, vector<1x64x1xf32>,
    return
  }
  func.func @transform_0(%arg0: i32) -> (i32, i32, i32) {
    %c0_i32 = arith.constant 0 : i32
    %c0_i32_0 = arith.constant 0 : i32
    %c0_i32_1 = arith.constant 0 : i32
    return %arg0, %c0_i32, %c0_i32_0 : i32, i32, i32
  }
  func.func @transform_1(%arg0: i32) -> (i32, i32) {
    %c0_i32 = arith.constant 0 : i32
    %c0_i32_0 = arith.constant 0 : i32
    %c0_i32_1 = arith.constant 0 : i32
    return %c0_i32, %c0_i32_0 : i32, i32
  }
  func.func @transform_2(%arg0: i32) -> (i32, i32) {
    %c0_i32 = arith.constant 0 : i32
    %c0_i32_0 = arith.constant 0 : i32
    %c0_i32_1 = arith.constant 0 : i32
    return %c0_i32, %c0_i32_0 : i32, i32
  }
  func.func @transform_3(%arg0: i32) -> (i32, i32, i32) {
    %c0_i32 = arith.constant 0 : i32
    %c0_i32_0 = arith.constant 0 : i32
    %c0_i32_1 = arith.constant 0 : i32
    return %arg0, %c0_i32, %c0_i32_0 : i32, i32, i32
  }
}

</mosaic_0001>

<bundles_post_ra>
// kernel: tpu_custom_call.1
= control target key start
LH: loop header
LB: loop body
LE: loop exit
PB: predicated region body
PF: predicated region fallthrough
CT: control target
= control target key end

     0   :  { %8 = vsyncpa [#allocation3], 0  ;;  %s1209_s12 = smov 0   ;;  %s1481_s0 = inlined_call_operand.vmem [shape: f32[4,64,8], index: 0, kind: input, shape index: {}]   ;;  %s1482_s1 = inlined_call_operand.hbm [shape: f32[392,128], index: 1, kind: input, shape index: {}]   ;;  %s1483_s2 = inlined_call_operand.vmem [shape: f32[12,128], index: 2, kind: input, shape index: {}]   ;;  %s1484_s3 = inlined_call_operand.vmem [shape: f32[4,64,1], index: 3, kind: output, shape index: {}]  }
   0x1 LB: > { %s124_s15 = sshll.u32 %s1482_s1, 4  ;;  %s1036_s16 = sadd.s32 4294967295, %s1184_s12   ;;  %s1184_s12 = sphi %s1209_s12, %s14_s12   ;;  %s125_s15 = int_to_ptr.hbm [resolvable:$true] %s124_s15 }
   0x2   : > { %p1038_p0 = scmp.ge.s32.totalorder %s1184_s12, 1  ;;  %p113_p1 = scmp.lt.s32.totalorder %s1184_s12, 5 }
   0x3   : > { %p1091_p2 = scmp.eq.s32.totalorder %s1036_s16, 0  ;;  %s1186_s17 = smov [#allocation2]  }
   0x4   : > { %p114_p3 = pnand %p1038_p0, %p113_p1  ;;  %s126_s18 = sshll.u32 %s1186_s17, 4  ;;  %s127_s18 = int_to_ptr.vmem [resolvable:$true] %s126_s18 }
   0x5   : > { %s1187_s19 = smov 128   ;;  %s1188_s20 = smov 8  }
   0x6   : > { %p1087_p4 = pneg %p114_p3  ;;  %153 = sbr.rel (%p114_p3) target bundleno = 1116 (0x45c), region = 32 }
   0x8   : > { %p1088_p5 = pnand %p1091_p2, %p1087_p4 }
   0xa   : > { %1090 = dma.hbm_to_vmem [thread:$0]  (!%p1088_p5), %s125_s15, 6272, %s127_s18, [#allocation3], %s1187_s19, %s1187_s19, %s1188_s20  }
   0xb   : > { %1179 = dma.done.wait (%p1091_p2), [#allocation3], 6272  }
   0xc   : > { %1181 = vsyncadd (%p1091_p2), [#allocation3], 4294961024  ;;  %p178_p6 = scmp.lt.s32.totalorder %s1036_s16, 3  ;;  %vm200_vm0 = vcmask 64512   ;;  %v198_v0 = vld [vmem:[#allocation2] sm:$0xff]  ;;  %v378_v30 = vld [vmem:[#allocation2 + $0x78] sm:$0xff] }
   0xd   : > { %240 = vmatpush.msra.mxu0 %v198_v0  ;;  %v1239_v14 = vld [vmem:[%s1483_s2] sm:$0xff]  ;;  %v377_v36 = vld [vmem:[#allocation2 + $0x70] sm:$0xff]  ;;  %v376_v40 = vld [vmem:[#allocation2 + $0x68] sm:$0xff] }
   0xe   : > { %s1504_s16 = smov (!%p178_p6, %s1036_s16), 3  ;;  %v199_v15 = vperm.slane %v1239_v14, 0  ;;  %v379_v29 = vld [vmem:[#allocation2 + $0x80] sm:$0xff]  ;;  %v374_v48 = vld [vmem:[#allocation2 + $0x58] sm:$0xff]  ;;  %v373_v52 = vld [vmem:[#allocation2 + $0x50] sm:$0xff] }
   0xf   : > { %s1065_s21 = sshll.u32 %s1504_s16, 6  ;;  %381 = vmatpush.msrb.mxu0 %v379_v29  ;;  %1067 = vmatpush.msra.mxu1 %v379_v29  ;;  %v375_v44 = vld [vmem:[#allocation2 + $0x60] sm:$0xff]  ;;  %v372_v55 = vld [vmem:[#allocation2 + $0x48] sm:$0xff]  ;;  %v370_v60 = vld [vmem:[#allocation2 + $0x38] sm:$0xff] }
  0x10   : > { %s182_s24 = scalar_lea.vmem %s1481_s0, %s1065_s21  ;;  %v371_v58 = vld [vmem:[#allocation2 + $0x40] sm:$0xff]  ;;  %v369_v62 = vld [vmem:[#allocation2 + $0x30] sm:$0xff]  ;;  %v368_v0 = vld [vmem:[#allocation2 + $0x28] sm:$0xff]  ;;  %s1429_s4 = scalar_lea.vmem %s1484_s3, %s1065_s21 }
  0x11   : > { %v188_v1 = vld [vmem:[%s182_s24] sm:$0xff]  ;;  %v189_v2 = vld [vmem:[%s182_s24 + $0x8] sm:$0xff]  ;;  %v190_v3 = vld [vmem:[%s182_s24 + $0x10] sm:$0xff]  ;;  %382 = vmatpush.msrb.mxu0 %v378_v30  ;;  %1068 = vmatpush.msra.mxu1 %v378_v30 }
  0x12   : > { %1047 = vmatmul.msk.f32.vlgmr.msra.gmra.mxu0 %vm200_vm0, %v188_v1  ;;  %v191_v4 = vld [vmem:[%s182_s24 + $0x18] sm:$0xff]  ;;  %v192_v5 = vld [vmem:[%s182_s24 + $0x20] sm:$0xff]  ;;  %v193_v6 = vld [vmem:[%s182_s24 + $0x28] sm:$0xff] }
  0x13   : > { %v194_v7 = vld [vmem:[%s182_s24 + $0x30] sm:$0xff]  ;;  %v195_v8 = vld [vmem:[%s182_s24 + $0x38] sm:$0xff]  ;;  %383 = vmatpush.msrb.mxu0 %v377_v36  ;;  %1069 = vmatpush.msra.mxu1 %v377_v36 }
  0x15   : > { %384 = vmatpush.msrb.mxu0 %v376_v40  ;;  %1070 = vmatpush.msra.mxu1 %v376_v40 }
  0x17   : > { %385 = vmatpush.msrb.mxu0 %v375_v44  ;;  %1071 = vmatpush.msra.mxu1 %v375_v44 }
  0x19   : > { %386 = vmatpush.msrb.mxu0 %v374_v48  ;;  %1072 = vmatpush.msra.mxu1 %v374_v48 }
  0x1a   : > { %1048 = vmatmul.msk.f32.gmra.mxu0 %vm200_vm0, %v189_v2  ;;  %v367_v2 = vld [vmem:[#allocation2 + $0x20] sm:$0xff] }
  0x1b   : > { %387 = vmatpush.msrb.mxu0 %v373_v52  ;;  %1073 = vmatpush.msra.mxu1 %v373_v52 }
  0x1d   : > { %388 = vmatpush.msrb.mxu0 %v372_v55  ;;  %1074 = vmatpush.msra.mxu1 %v372_v55 }
  0x1f   : > { %389 = vmatpush.msrb.mxu0 %v371_v58  ;;  %1075 = vmatpush.msra.mxu1 %v371_v58 }
  0x21   : > { %390 = vmatpush.msrb.mxu0 %v370_v60  ;;  %1076 = vmatpush.msra.mxu1 %v370_v60 }
  0x22   : > { %1049 = vmatmul.msk.f32.gmra.mxu0 %vm200_vm0, %v190_v3 }
  0x23   : > { %391 = vmatpush.msrb.mxu0 %v369_v62  ;;  %1077 = vmatpush.msra.mxu1 %v369_v62 }
  0x25   : > { %392 = vmatpush.msrb.mxu0 %v368_v0  ;;  %1078 = vmatpush.msra.mxu1 %v368_v0 }
  0x27   : > { %393 = vmatpush.msrb.mxu0 %v367_v2  ;;  %1079 = vmatpush.msra.mxu1 %v367_v2 }
  0x2a   : > { %1050 = vmatmul.msk.f32.gmra.mxu0 %vm200_vm0, %v191_v4  ;;  %v366_v4 = vld [vmem:[#allocation2 + $0x18] sm:$0xff] }
  0x2b   : > { %394 = vmatpush.msrb.mxu0 %v366_v4  ;;  %1080 = vmatpush.msra.mxu1 %v366_v4 }
  0x32   : > { %1051 = vmatmul.msk.f32.gmra.mxu0 %vm200_vm0, %v192_v5 }
  0x3a   : > { %1052 = vmatmul.msk.f32.gmra.mxu0 %vm200_vm0, %v193_v6  ;;  %v365_v6 = vld [vmem:[#allocation2 + $0x10] sm:$0xff] }
  0x3b   : > { %395 = vmatpush.msrb.mxu0 %v365_v6  ;;  %1081 = vmatpush.msra.mxu1 %v365_v6 }
  0x42   : > { %1053 = vmatmul.msk.f32.gmra.mxu0 %vm200_vm0, %v194_v7 }
  0x4a   : > { %1054 = vmatmul.msk.f32.gmra.mxu0 %vm200_vm0, %v195_v8  ;;  %v364_v8 = vld [vmem:[#allocation2 + $0x8] sm:$0xff] }
  0x4b   : > { %396 = vmatpush.msrb.mxu0 %v364_v8  ;;  %1082 = vmatpush.msra.mxu1 %v364_v8 }
  0x8f   : > { %v242_v9 = vpop.f32.mrf.mxu0 }
  0x90   : > { %v243_v18 = vadd.f32 %v242_v9, %v199_v15 }
  0x92   : > { %v274_v22 = vmul.f32 0.01, %v243_v18  ;;  %vm266_vm2 = vcmp.ge.f32.partialorder %v243_v18, 0.0 }
  0x94   : > { %v1244_v31 = vsel %vm266_vm2, %v243_v18, %v274_v22 }
  0x97   : > { %v245_v10 = vpop.f32.mrf.mxu0 }
  0x98   : > { %v246_v16 = vadd.f32 %v245_v10, %v199_v15 }
  0x9a   : > { %v275_v20 = vmul.f32 0.01, %v246_v16  ;;  %vm267_vm1 = vcmp.ge.f32.partialorder %v246_v16, 0.0 }
  0x9c   : > { %v1242_v25 = vsel %vm267_vm1, %v246_v16, %v275_v20 }
  0x9d   : > { %v290_v35 = vadd.f32 %v1242_v25, %v1244_v31 }
  0x9f   : > { %v248_v11 = vpop.f32.mrf.mxu0 }
  0xa0   : > { %v249_v19 = vadd.f32 %v248_v11, %v199_v15 }
  0xa2   : > { %v276_v23 = vmul.f32 0.01, %v249_v19  ;;  %vm268_vm3 = vcmp.ge.f32.partialorder %v249_v19, 0.0 }
  0xa4   : > { %v1246_v32 = vsel %vm268_vm3, %v249_v19, %v276_v23 }
  0xa5   : > { %v291_v39 = vadd.f32 %v290_v35, %v1246_v32 }
  0xa7   : > { %v251_v12 = vpop.f32.mrf.mxu0 }
  0xa8   : > { %v252_v21 = vadd.f32 %v251_v12, %v199_v15 }
  0xaa   : > { %v277_v26 = vmul.f32 0.01, %v252_v21  ;;  %vm269_vm4 = vcmp.ge.f32.partialorder %v252_v21, 0.0 }
  0xac   : > { %v1250_v37 = vsel %vm269_vm4, %v252_v21, %v277_v26 }
  0xad   : > { %v292_v43 = vadd.f32 %v291_v39, %v1250_v37 }
  0xaf   : > { %v254_v13 = vpop.f32.mrf.mxu0 }
  0xb0   : > { %v255_v24 = vadd.f32 %v254_v13, %v199_v15 }
  0xb2   : > { %v278_v33 = vmul.f32 0.01, %v255_v24  ;;  %vm270_vm5 = vcmp.ge.f32.partialorder %v255_v24, 0.0 }
  0xb4   : > { %v1253_v41 = vsel %vm270_vm5, %v255_v24, %v278_v33 }
  0xb5   : > { %v293_v46 = vadd.f32 %v292_v43, %v1253_v41 }
  0xb7   : > { %v257_v17 = vpop.f32.mrf.mxu0 }
  0xb8   : > { %v258_v27 = vadd.f32 %v257_v17, %v199_v15 }
  0xba   : > { %v279_v38 = vmul.f32 0.01, %v258_v27  ;;  %vm271_vm6 = vcmp.ge.f32.partialorder %v258_v27, 0.0 }
  0xbc   : > { %v1256_v45 = vsel %vm271_vm6, %v258_v27, %v279_v38 }
  0xbd   : > { %v294_v51 = vadd.f32 %v293_v46, %v1256_v45 }
  0xbf   : > { %v260_v28 = vpop.f32.mrf.mxu0 }
  0xc0   : > { %v261_v34 = vadd.f32 %v260_v28, %v199_v15 }
  0xc2   : > { %v280_v42 = vmul.f32 0.01, %v261_v34  ;;  %vm272_vm7 = vcmp.ge.f32.partialorder %v261_v34, 0.0 }
  0xc4   : > { %v288_v49 = vsel %vm272_vm7, %v261_v34, %v280_v42 }
  0xc5   : > { %v295_v54 = vadd.f32 %v294_v51, %v288_v49 }
  0xc7   : > { %v263_v47 = vpop.f32.mrf.mxu0 }
  0xc8   : > { %v264_v50 = vadd.f32 %v263_v47, %v199_v15 }
  0xca   : > { %vm273_vm8 = vcmp.ge.f32.partialorder %v264_v50, 0.0  ;;  %v281_v53 = vmul.f32 0.01, %v264_v50 }
  0xcc   : > { %v289_v56 = vsel %vm273_vm8, %v264_v50, %v281_v53  ;;  %v355_v50 = vperm.slane %v1239_v14, 2 }
  0xcd   : > { %v296_v57 = vadd.f32 %v295_v54, %v289_v56 }
  0xcf   : > { %v297_v59 = vrot.slane %v296_v57, 4 }
  0xd1   : > { %v298_v61 = vadd.f32 %v297_v59, %v296_v57 }
  0xd3   : > { %v299_v63 = vrot.slane %v298_v61, 2 }
  0xd5   : > { %v300_v1 = vadd.f32 %v299_v63, %v298_v61 }
  0xd7   : > { %v301_v3 = vrot.slane %v300_v1, 1 }
  0xd9   : > { %v302_v5 = vadd.f32 %v301_v3, %v300_v1 }
  0xdb   : > { %v303_v7 = vmul.f32 0.015625, %v302_v5 }
  0xdd   : > { %v304_v9 = vsub.f32 %v1244_v31, %v303_v7  ;;  %v305_v10 = vsub.f32 %v1242_v25, %v303_v7  ;;  %v306_v11 = vsub.f32 %v1246_v32, %v303_v7  ;;  %v307_v12 = vsub.f32 %v1250_v37, %v303_v7 }
  0xde   : > { %v308_v16 = vsub.f32 %v1253_v41, %v303_v7  ;;  %v309_v19 = vsub.f32 %v1256_v45, %v303_v7  ;;  %v310_v22 = vsub.f32 %v288_v49, %v303_v7  ;;  %v311_v25 = vsub.f32 %v289_v56, %v303_v7 }
  0xdf   : > { %v312_v13 = vmul.f32 %v304_v9, %v304_v9  ;;  %v313_v15 = vmul.f32 %v305_v10, %v305_v10  ;;  %v314_v17 = vmul.f32 %v306_v11, %v306_v11  ;;  %v315_v20 = vmul.f32 %v307_v12, %v307_v12 }
  0xe0   : > { %v316_v23 = vmul.f32 %v308_v16, %v308_v16  ;;  %v317_v26 = vmul.f32 %v309_v19, %v309_v19  ;;  %v318_v28 = vmul.f32 %v310_v22, %v310_v22  ;;  %v319_v30 = vmul.f32 %v311_v25, %v311_v25 }
  0xe1   : > { %v320_v18 = vadd.f32 %v313_v15, %v312_v13  ;;  %v380_v7 = vperm.slane %v1239_v14, 3 }
  0xe3   : > { %v321_v21 = vadd.f32 %v320_v18, %v314_v17 }
  0xe5   : > { %v322_v24 = vadd.f32 %v321_v21, %v315_v20 }
  0xe7   : > { %v323_v27 = vadd.f32 %v322_v24, %v316_v23  ;;  %v535_v24 = vld [vmem:[#allocation2 + $0x100] sm:$0xff] }
  0xe8   : > { %537 = vmatpush.msra.mxu2 %v535_v24 }
  0xe9   : > { %v324_v29 = vadd.f32 %v323_v27, %v317_v26 }
  0xeb   : > { %v325_v31 = vadd.f32 %v324_v29, %v318_v28 }
  0xed   : > { %v326_v32 = vadd.f32 %v325_v31, %v319_v30  ;;  %v533_v30 = vld [vmem:[#allocation2 + $0xf0] sm:$0xff] }
  0xef   : > { %v327_v33 = vrot.slane %v326_v32, 4 }
  0xf1   : > { %v328_v34 = vadd.f32 %v327_v33, %v326_v32 }
  0xf3   : > { %v329_v35 = vrot.slane %v328_v34, 2 }
  0xf5   : > { %v330_v36 = vadd.f32 %v329_v35, %v328_v34  ;;  %v532_v34 = vld [vmem:[#allocation2 + $0xe8] sm:$0xff] }
  0xf7   : > { %v331_v37 = vrot.slane %v330_v36, 1 }
  0xf9   : > { %v332_v38 = vadd.f32 %v331_v37, %v330_v36 }
  0xfb   : > { %v333_v39 = vmul.f32 0.015625, %v332_v38  ;;  %v531_v38 = vld [vmem:[#allocation2 + $0xe0] sm:$0xff] }
  0xfd   : > { %v334_v40 = vadd.f32 1e-05, %v333_v39 }
  0xff   : > { %1104 = vrsqrt.f32 %v334_v40  ;;  %vm341_vm10 = vweird.f32 %v334_v40 }
 0x105   : > { %v1105_v41 = vpop.eup %1104 }
 0x106   : > { %v336_v42 = vmul.f32 %v1105_v41, %v334_v40  ;;  %vm342_vm9 = vweird.f32 %v1105_v41 }
 0x107   : > { %vm343_vm11 = vmor %vm341_vm10, %vm342_vm9 }
 0x108   : > { %v337_v43 = vmul.f32 %v1105_v41, %v336_v42  ;;  %v530_v42 = vld [vmem:[#allocation2 + $0xd8] sm:$0xff] }
 0x10a   : > { %v338_v44 = vmul.f32 0.5, %v337_v43 }
 0x10c   : > { %v339_v45 = vsub.f32 1.5, %v338_v44 }
 0x10e   : > { %v340_v46 = vmul.f32 %v1105_v41, %v339_v45 }
 0x110   : > { %v344_v47 = vsel %vm343_vm11, %v1105_v41, %v340_v46  ;;  %v529_v46 = vld [vmem:[#allocation2 + $0xd0] sm:$0xff] }
 0x111   : > { %v345_v48 = vmul.f32 %v344_v47, %v1239_v14 }
 0x113   : > { %v346_v49 = vperm.slane %v345_v48, 1 }
 0x115   : > { %v347_v51 = vmul.f32 %v346_v49, %v304_v9  ;;  %v348_v52 = vmul.f32 %v346_v49, %v305_v10  ;;  %v349_v55 = vmul.f32 %v346_v49, %v306_v11  ;;  %v350_v57 = vmul.f32 %v346_v49, %v307_v12 }
 0x116   : > { %v351_v59 = vmul.f32 %v346_v49, %v308_v16  ;;  %v352_v61 = vmul.f32 %v346_v49, %v309_v19  ;;  %v353_v63 = vmul.f32 %v346_v49, %v310_v22  ;;  %v354_v1 = vmul.f32 %v346_v49, %v311_v25  ;;  %v534_v25 = vld [vmem:[#allocation2 + $0xf8] sm:$0xff]  ;;  %v528_v49 = vld [vmem:[#allocation2 + $0xc8] sm:$0xff] }
 0x117   : > { %v356_v53 = vadd.f32 %v355_v50, %v347_v51  ;;  %v357_v54 = vadd.f32 %v355_v50, %v348_v52  ;;  %v358_v56 = vadd.f32 %v355_v50, %v349_v55  ;;  %v359_v58 = vadd.f32 %v355_v50, %v350_v57  ;;  %538 = vmatpush.msra.mxu2 %v534_v25  ;;  %v527_v52 = vld [vmem:[#allocation2 + $0xc0] sm:$0xff] }
 0x118   : > { %v360_v60 = vadd.f32 %v355_v50, %v351_v59  ;;  %v361_v62 = vadd.f32 %v355_v50, %v352_v61  ;;  %v362_v0 = vadd.f32 %v355_v50, %v353_v63  ;;  %v363_v2 = vadd.f32 %v355_v50, %v354_v1 }
 0x119   : > { %397 = vmatmul.f32.vlgmr.msrb.gmra.mxu0 %v356_v53  ;;  %400 = vmatmul.f32.vlgmr.msra.gmra.mxu1 %v357_v54  ;;  %v526_v54 = vld [vmem:[#allocation2 + $0xb8] sm:$0xff] }
 0x11a   : > { %539 = vmatpush.msra.mxu2 %v533_v30 }
 0x11c   : > { %540 = vmatpush.msra.mxu2 %v532_v34 }
 0x11e   : > { %541 = vmatpush.msra.mxu2 %v531_v38 }
 0x120   : > { %542 = vmatpush.msra.mxu2 %v530_v42 }
 0x121   : > { %403 = vmatmul.f32.gmra.mxu1 %v358_v56  ;;  %v525_v56 = vld [vmem:[#allocation2 + $0xb0] sm:$0xff] }
 0x122   : > { %543 = vmatpush.msra.mxu2 %v529_v46 }
 0x124   : > { %544 = vmatpush.msra.mxu2 %v528_v49 }
 0x126   : > { %545 = vmatpush.msra.mxu2 %v527_v52 }
 0x128   : > { %546 = vmatpush.msra.mxu2 %v526_v54 }
 0x129   : > { %406 = vmatmul.f32.gmra.mxu1 %v359_v58  ;;  %v524_v58 = vld [vmem:[#allocation2 + $0xa8] sm:$0xff] }
 0x12a   : > { %547 = vmatpush.msra.mxu2 %v525_v56 }
 0x12c   : > { %548 = vmatpush.msra.mxu2 %v524_v58 }
 0x131   : > { %409 = vmatmul.f32.gmra.mxu1 %v360_v60  ;;  %v523_v60 = vld [vmem:[#allocation2 + $0xa0] sm:$0xff] }
 0x132   : > { %549 = vmatpush.msra.mxu2 %v523_v60 }
 0x139   : > { %412 = vmatmul.f32.gmra.mxu1 %v361_v62  ;;  %v522_v62 = vld [vmem:[#allocation2 + $0x98] sm:$0xff] }
 0x13a   : > { %550 = vmatpush.msra.mxu2 %v522_v62 }
 0x141   : > { %415 = vmatmul.f32.gmra.mxu1 %v362_v0  ;;  %v521_v0 = vld [vmem:[#allocation2 + $0x90] sm:$0xff] }
 0x142   : > { %551 = vmatpush.msra.mxu2 %v521_v0 }
 0x149   : > { %418 = vmatmul.f32.gmra.mxu1 %v363_v2  ;;  %v520_v2 = vld [vmem:[#allocation2 + $0x88] sm:$0xff] }
 0x14a   : > { %552 = vmatpush.msra.mxu2 %v520_v2  ;;  %v536_v2 = vperm.slane %v1239_v14, 6 }
 0x196   : > { %v401_v3 = vpop.f32.mrf.mxu1  ;;  %v398_v8 = vpop.f32.mrf.mxu0 }
 0x197   : > { %v399_v9 = vadd.f32 %v398_v8, %v380_v7  ;;  %v402_v10 = vadd.f32 %v401_v3, %v380_v7 }
 0x199   : > { %v430_v13 = vmul.f32 0.01, %v399_v9  ;;  %v431_v15 = vmul.f32 0.01, %v402_v10  ;;  %vm422_vm12 = vcmp.ge.f32.partialorder %v399_v9, 0.0  ;;  %vm423_vm13 = vcmp.ge.f32.partialorder %v402_v10, 0.0 }
 0x19b   : > { %v1269_v19 = vsel %vm422_vm12, %v399_v9, %v430_v13  ;;  %v1271_v20 = vsel %vm423_vm13, %v402_v10, %v431_v15 }
 0x19c   : > { %v446_v29 = vadd.f32 %v1271_v20, %v1269_v19 }
 0x19e   : > { %v404_v4 = vpop.f32.mrf.mxu1 }
 0x19f   : > { %v405_v12 = vadd.f32 %v404_v4, %v380_v7 }
 0x1a1   : > { %v432_v17 = vmul.f32 0.01, %v405_v12  ;;  %vm424_vm14 = vcmp.ge.f32.partialorder %v405_v12, 0.0 }
 0x1a3   : > { %v440_v26 = vsel %vm424_vm14, %v405_v12, %v432_v17 }
 0x1a4   : > { %v447_v33 = vadd.f32 %v446_v29, %v440_v26 }
 0x1a6   : > { %v407_v5 = vpop.f32.mrf.mxu1 }
 0x1a7   : > { %v408_v16 = vadd.f32 %v407_v5, %v380_v7 }
 0x1a9   : > { %v433_v21 = vmul.f32 0.01, %v408_v16  ;;  %vm425_vm15 = vcmp.ge.f32.partialorder %v408_v16, 0.0 }
 0x1ab   : > { %v441_v31 = vsel %vm425_vm15, %v408_v16, %v433_v21 }
 0x1ac   : > { %v448_v37 = vadd.f32 %v447_v33, %v441_v31 }
 0x1ae   : > { %v410_v6 = vpop.f32.mrf.mxu1 }
 0x1af   : > { %v411_v18 = vadd.f32 %v410_v6, %v380_v7 }
 0x1b1   : > { %v434_v27 = vmul.f32 0.01, %v411_v18  ;;  %vm426_vm0 = vcmp.ge.f32.partialorder %v411_v18, 0.0 }
 0x1b3   : > { %v442_v35 = vsel %vm426_vm0, %v411_v18, %v434_v27 }
 0x1b4   : > { %v449_v40 = vadd.f32 %v448_v37, %v442_v35 }
 0x1b6   : > { %v413_v11 = vpop.f32.mrf.mxu1 }
 0x1b7   : > { %v414_v22 = vadd.f32 %v413_v11, %v380_v7 }
 0x1b9   : > { %v435_v32 = vmul.f32 0.01, %v414_v22  ;;  %vm427_vm1 = vcmp.ge.f32.partialorder %v414_v22, 0.0 }
 0x1bb   : > { %v443_v39 = vsel %vm427_vm1, %v414_v22, %v435_v32 }
 0x1bc   : > { %v450_v45 = vadd.f32 %v449_v40, %v443_v39 }
 0x1be   : > { %v416_v23 = vpop.f32.mrf.mxu1 }
 0x1bf   : > { %v417_v28 = vadd.f32 %v416_v23, %v380_v7 }
 0x1c1   : > { %v436_v36 = vmul.f32 0.01, %v417_v28  ;;  %vm428_vm2 = vcmp.ge.f32.partialorder %v417_v28, 0.0 }
 0x1c3   : > { %v444_v43 = vsel %vm428_vm2, %v417_v28, %v436_v36 }
 0x1c4   : > { %v451_v48 = vadd.f32 %v450_v45, %v444_v43 }
 0x1c6   : > { %v419_v41 = vpop.f32.mrf.mxu1 }
 0x1c7   : > { %v420_v44 = vadd.f32 %v419_v41, %v380_v7 }
 0x1c9   : > { %vm429_vm3 = vcmp.ge.f32.partialorder %v420_v44, 0.0  ;;  %v437_v47 = vmul.f32 0.01, %v420_v44 }
 0x1cb   : > { %v445_v50 = vsel %vm429_vm3, %v420_v44, %v437_v47  ;;  %v511_v44 = vperm.slane %v1239_v14, 5 }
 0x1cc   : > { %v452_v51 = vadd.f32 %v451_v48, %v445_v50 }
 0x1ce   : > { %v453_v53 = vrot.slane %v452_v51, 4 }
 0x1d0   : > { %v454_v55 = vadd.f32 %v453_v53, %v452_v51 }
 0x1d2   : > { %v455_v57 = vrot.slane %v454_v55, 2 }
 0x1d4   : > { %v456_v59 = vadd.f32 %v455_v57, %v454_v55 }
 0x1d6   : > { %v457_v61 = vrot.slane %v456_v59, 1 }
 0x1d8   : > { %v458_v63 = vadd.f32 %v457_v61, %v456_v59 }
 0x1da   : > { %v459_v1 = vmul.f32 0.015625, %v458_v63 }
 0x1dc   : > { %v460_v3 = vsub.f32 %v1269_v19, %v459_v1  ;;  %v461_v4 = vsub.f32 %v1271_v20, %v459_v1  ;;  %v462_v5 = vsub.f32 %v440_v26, %v459_v1  ;;  %v463_v6 = vsub.f32 %v441_v31, %v459_v1 }
 0x1dd   : > { %v464_v9 = vsub.f32 %v442_v35, %v459_v1  ;;  %v465_v12 = vsub.f32 %v443_v39, %v459_v1  ;;  %v466_v16 = vsub.f32 %v444_v43, %v459_v1  ;;  %v467_v21 = vsub.f32 %v445_v50, %v459_v1 }
 0x1de   : > { %v468_v7 = vmul.f32 %v460_v3, %v460_v3  ;;  %v469_v8 = vmul.f32 %v461_v4, %v461_v4  ;;  %v470_v10 = vmul.f32 %v462_v5, %v462_v5  ;;  %v471_v13 = vmul.f32 %v463_v6, %v463_v6 }
 0x1df   : > { %v472_v17 = vmul.f32 %v464_v9, %v464_v9  ;;  %v473_v22 = vmul.f32 %v465_v12, %v465_v12  ;;  %v474_v19 = vmul.f32 %v466_v16, %v466_v16  ;;  %v475_v20 = vmul.f32 %v467_v21, %v467_v21 }
 0x1e0   : > { %v476_v11 = vadd.f32 %v469_v8, %v468_v7 }
 0x1e2   : > { %v477_v15 = vadd.f32 %v476_v11, %v470_v10 }
 0x1e4   : > { %v478_v18 = vadd.f32 %v477_v15, %v471_v13 }
 0x1e6   : > { %v479_v23 = vadd.f32 %v478_v18, %v472_v17  ;;  %v691_v17 = vld [vmem:[#allocation2 + $0x180] sm:$0xff]  ;;  %v690_v18 = vld [vmem:[#allocation2 + $0x178] sm:$0xff] }
 0x1e7   : > { %693 = vmatpush.msra.mxu3 %v691_v17 }
 0x1e8   : > { %v480_v24 = vadd.f32 %v479_v23, %v473_v22 }
 0x1e9   : > { %694 = vmatpush.msra.mxu3 %v690_v18 }
 0x1ea   : > { %v481_v25 = vadd.f32 %v480_v24, %v474_v19 }
 0x1ec   : > { %v482_v26 = vadd.f32 %v481_v25, %v475_v20  ;;  %v689_v20 = vld [vmem:[#allocation2 + $0x170] sm:$0xff] }
 0x1ed   : > { %695 = vmatpush.msra.mxu3 %v689_v20 }
 0x1ee   : > { %v483_v27 = vrot.slane %v482_v26, 4 }
 0x1f0   : > { %v484_v28 = vadd.f32 %v483_v27, %v482_v26 }
 0x1f2   : > { %v485_v29 = vrot.slane %v484_v28, 2 }
 0x1f4   : > { %v486_v30 = vadd.f32 %v485_v29, %v484_v28  ;;  %v688_v28 = vld [vmem:[#allocation2 + $0x168] sm:$0xff] }
 0x1f5   : > { %696 = vmatpush.msra.mxu3 %v688_v28 }
 0x1f6   : > { %v487_v31 = vrot.slane %v486_v30, 1 }
 0x1f8   : > { %v488_v32 = vadd.f32 %v487_v31, %v486_v30 }
 0x1fa   : > { %v489_v33 = vmul.f32 0.015625, %v488_v32  ;;  %v687_v32 = vld [vmem:[#allocation2 + $0x160] sm:$0xff] }
 0x1fb   : > { %697 = vmatpush.msra.mxu3 %v687_v32 }
 0x1fc   : > { %v490_v34 = vadd.f32 1e-05, %v489_v33 }
 0x1fe   : > { %1106 = vrsqrt.f32 %v490_v34  ;;  %vm497_vm5 = vweird.f32 %v490_v34 }
 0x204   : > { %v1107_v35 = vpop.eup %1106 }
 0x205   : > { %v492_v36 = vmul.f32 %v1107_v35, %v490_v34  ;;  %vm498_vm4 = vweird.f32 %v1107_v35 }
 0x206   : > { %vm499_vm6 = vmor %vm497_vm5, %vm498_vm4 }
 0x207   : > { %v493_v37 = vmul.f32 %v1107_v35, %v492_v36  ;;  %v686_v36 = vld [vmem:[#allocation2 + $0x158] sm:$0xff] }
 0x208   : > { %698 = vmatpush.msra.mxu3 %v686_v36 }
 0x209   : > { %v494_v38 = vmul.f32 0.5, %v493_v37 }
 0x20b   : > { %v495_v39 = vsub.f32 1.5, %v494_v38 }
 0x20d   : > { %v496_v40 = vmul.f32 %v1107_v35, %v495_v39 }
 0x20f   : > { %v500_v41 = vsel %vm499_vm6, %v1107_v35, %v496_v40  ;;  %v685_v40 = vld [vmem:[#allocation2 + $0x150] sm:$0xff] }
 0x210   : > { %v501_v42 = vmul.f32 %v500_v41, %v1239_v14  ;;  %699 = vmatpush.msra.mxu3 %v685_v40 }
 0x212   : > { %v502_v43 = vperm.slane %v501_v42, 4 }
 0x214   : > { %v503_v45 = vmul.f32 %v502_v43, %v460_v3  ;;  %v504_v47 = vmul.f32 %v502_v43, %v461_v4  ;;  %v505_v49 = vmul.f32 %v502_v43, %v462_v5  ;;  %v506_v51 = vmul.f32 %v502_v43, %v463_v6 }
 0x215   : > { %v507_v53 = vmul.f32 %v502_v43, %v464_v9  ;;  %v508_v55 = vmul.f32 %v502_v43, %v465_v12  ;;  %v509_v57 = vmul.f32 %v502_v43, %v466_v16  ;;  %v510_v59 = vmul.f32 %v502_v43, %v467_v21  ;;  %v684_v43 = vld [vmem:[#allocation2 + $0x148] sm:$0xff] }
 0x216   : > { %v512_v46 = vadd.f32 %v511_v44, %v503_v45  ;;  %v513_v48 = vadd.f32 %v511_v44, %v504_v47  ;;  %v514_v50 = vadd.f32 %v511_v44, %v505_v49  ;;  %v515_v52 = vadd.f32 %v511_v44, %v506_v51  ;;  %700 = vmatpush.msra.mxu3 %v684_v43 }
 0x217   : > { %v516_v54 = vadd.f32 %v511_v44, %v507_v53  ;;  %v517_v56 = vadd.f32 %v511_v44, %v508_v55  ;;  %v518_v58 = vadd.f32 %v511_v44, %v509_v57  ;;  %v519_v60 = vadd.f32 %v511_v44, %v510_v59 }
 0x218   : > { %553 = vmatmul.f32.vlgmr.msra.gmra.mxu2 %v512_v46  ;;  %v683_v46 = vld [vmem:[#allocation2 + $0x140] sm:$0xff] }
 0x219   : > { %701 = vmatpush.msra.mxu3 %v683_v46 }
 0x220   : > { %556 = vmatmul.f32.gmra.mxu2 %v513_v48  ;;  %v682_v48 = vld [vmem:[#allocation2 + $0x138] sm:$0xff] }
 0x221   : > { %702 = vmatpush.msra.mxu3 %v682_v48 }
 0x228   : > { %559 = vmatmul.f32.gmra.mxu2 %v514_v50  ;;  %v681_v50 = vld [vmem:[#allocation2 + $0x130] sm:$0xff] }
 0x229   : > { %703 = vmatpush.msra.mxu3 %v681_v50 }
 0x230   : > { %562 = vmatmul.f32.gmra.mxu2 %v515_v52  ;;  %v680_v52 = vld [vmem:[#allocation2 + $0x128] sm:$0xff] }
 0x231   : > { %704 = vmatpush.msra.mxu3 %v680_v52 }
 0x238   : > { %565 = vmatmul.f32.gmra.mxu2 %v516_v54  ;;  %v679_v54 = vld [vmem:[#allocation2 + $0x120] sm:$0xff] }
 0x239   : > { %705 = vmatpush.msra.mxu3 %v679_v54 }
 0x240   : > { %568 = vmatmul.f32.gmra.mxu2 %v517_v56  ;;  %v678_v56 = vld [vmem:[#allocation2 + $0x118] sm:$0xff] }
 0x241   : > { %706 = vmatpush.msra.mxu3 %v678_v56 }
 0x248   : > { %571 = vmatmul.f32.gmra.mxu2 %v518_v58  ;;  %v677_v58 = vld [vmem:[#allocation2 + $0x110] sm:$0xff] }
 0x249   : > { %707 = vmatpush.msra.mxu3 %v677_v58 }
 0x250   : > { %574 = vmatmul.f32.gmra.mxu2 %v519_v60  ;;  %v676_v60 = vld [vmem:[#allocation2 + $0x108] sm:$0xff] }
 0x251   : > { %708 = vmatpush.msra.mxu3 %v676_v60 }
 0x29b   : > { %v554_v61 = vpop.f32.mrf.mxu2 }
 0x29c   : > { %v555_v5 = vadd.f32 %v554_v61, %v536_v2 }
 0x29e   : > { %v586_v9 = vmul.f32 0.01, %v555_v5  ;;  %vm578_vm8 = vcmp.ge.f32.partialorder %v555_v5, 0.0 }
 0x2a0   : > { %v594_v21 = vsel %vm578_vm8, %v555_v5, %v586_v9 }
 0x2a3   : > { %v557_v62 = vpop.f32.mrf.mxu2 }
 0x2a4   : > { %v558_v3 = vadd.f32 %v557_v62, %v536_v2 }
 0x2a6   : > { %v587_v7 = vmul.f32 0.01, %v558_v3  ;;  %vm579_vm7 = vcmp.ge.f32.partialorder %v558_v3, 0.0 }
 0x2a8   : > { %v1280_v12 = vsel %vm579_vm7, %v558_v3, %v587_v7 }
 0x2a9   : > { %v602_v24 = vadd.f32 %v1280_v12, %v594_v21 }
 0x2ab   : > { %v560_v63 = vpop.f32.mrf.mxu2 }
 0x2ac   : > { %v561_v6 = vadd.f32 %v560_v63, %v536_v2 }
 0x2ae   : > { %v588_v10 = vmul.f32 0.01, %v561_v6  ;;  %vm580_vm9 = vcmp.ge.f32.partialorder %v561_v6, 0.0 }
 0x2b0   : > { %v596_v22 = vsel %vm580_vm9, %v561_v6, %v588_v10 }
 0x2b1   : > { %v603_v27 = vadd.f32 %v602_v24, %v596_v22 }
 0x2b3   : > { %v563_v0 = vpop.f32.mrf.mxu2 }
 0x2b4   : > { %v564_v8 = vadd.f32 %v563_v0, %v536_v2 }
 0x2b6   : > { %v589_v13 = vmul.f32 0.01, %v564_v8  ;;  %vm581_vm10 = vcmp.ge.f32.partialorder %v564_v8, 0.0 }
 0x2b8   : > { %v597_v25 = vsel %vm581_vm10, %v564_v8, %v589_v13 }
 0x2b9   : > { %v604_v31 = vadd.f32 %v603_v27, %v597_v25 }
 0x2bb   : > { %v566_v1 = vpop.f32.mrf.mxu2 }
 0x2bc   : > { %v567_v11 = vadd.f32 %v566_v1, %v536_v2 }
 0x2be   : > { %v590_v23 = vmul.f32 0.01, %v567_v11  ;;  %vm582_vm11 = vcmp.ge.f32.partialorder %v567_v11, 0.0 }
 0x2c0   : > { %v598_v29 = vsel %vm582_vm11, %v567_v11, %v590_v23 }
 0x2c1   : > { %v605_v34 = vadd.f32 %v604_v31, %v598_v29 }
 0x2c3   : > { %v569_v4 = vpop.f32.mrf.mxu2 }
 0x2c4   : > { %v570_v15 = vadd.f32 %v569_v4, %v536_v2 }
 0x2c6   : > { %v591_v26 = vmul.f32 0.01, %v570_v15  ;;  %vm583_vm12 = vcmp.ge.f32.partialorder %v570_v15, 0.0 }
 0x2c8   : > { %v599_v33 = vsel %vm583_vm12, %v570_v15, %v591_v26 }
 0x2c9   : > { %v606_v39 = vadd.f32 %v605_v34, %v599_v33 }
 0x2cb   : > { %v572_v16 = vpop.f32.mrf.mxu2 }
 0x2cc   : > { %v573_v19 = vadd.f32 %v572_v16, %v536_v2 }
 0x2ce   : > { %v592_v30 = vmul.f32 0.01, %v573_v19  ;;  %vm584_vm13 = vcmp.ge.f32.partialorder %v573_v19, 0.0 }
 0x2d0   : > { %v600_v37 = vsel %vm584_vm13, %v573_v19, %v592_v30 }
 0x2d1   : > { %v607_v42 = vadd.f32 %v606_v39, %v600_v37 }
 0x2d3   : > { %v575_v35 = vpop.f32.mrf.mxu2 }
 0x2d4   : > { %v576_v38 = vadd.f32 %v575_v35, %v536_v2  ;;  %v1287_v35 = vld [vmem:[%s1483_s2 + $0x8] sm:$0xf] }
 0x2d5   : > { %v667_v39 = vperm.slane %v1287_v35, 0 }
 0x2d6   : > { %vm585_vm14 = vcmp.ge.f32.partialorder %v576_v38, 0.0  ;;  %v593_v41 = vmul.f32 0.01, %v576_v38 }
 0x2d8   : > { %v601_v44 = vsel %vm585_vm14, %v576_v38, %v593_v41 }
 0x2d9   : > { %v608_v45 = vadd.f32 %v607_v42, %v601_v44 }
 0x2db   : > { %v609_v47 = vrot.slane %v608_v45, 4 }
 0x2dd   : > { %v610_v49 = vadd.f32 %v609_v47, %v608_v45 }
 0x2df   : > { %v611_v51 = vrot.slane %v610_v49, 2 }
 0x2e1   : > { %v612_v53 = vadd.f32 %v611_v51, %v610_v49 }
 0x2e3   : > { %v613_v55 = vrot.slane %v612_v53, 1 }
 0x2e5   : > { %v614_v57 = vadd.f32 %v613_v55, %v612_v53 }
 0x2e7   : > { %v615_v59 = vmul.f32 0.015625, %v614_v57 }
 0x2e9   : > { %v616_v61 = vsub.f32 %v594_v21, %v615_v59  ;;  %v617_v62 = vsub.f32 %v1280_v12, %v615_v59  ;;  %v618_v63 = vsub.f32 %v596_v22, %v615_v59  ;;  %v619_v0 = vsub.f32 %v597_v25, %v615_v59 }
 0x2ea   : > { %v620_v3 = vsub.f32 %v598_v29, %v615_v59  ;;  %v621_v6 = vsub.f32 %v599_v33, %v615_v59  ;;  %v622_v9 = vsub.f32 %v600_v37, %v615_v59  ;;  %v623_v13 = vsub.f32 %v601_v44, %v615_v59 }
 0x2eb   : > { %v624_v1 = vmul.f32 %v616_v61, %v616_v61  ;;  %v625_v2 = vmul.f32 %v617_v62, %v617_v62  ;;  %v626_v4 = vmul.f32 %v618_v63, %v618_v63  ;;  %v627_v7 = vmul.f32 %v619_v0, %v619_v0 }
 0x2ec   : > { %v628_v10 = vmul.f32 %v620_v3, %v620_v3  ;;  %v629_v15 = vmul.f32 %v621_v6, %v621_v6  ;;  %v630_v17 = vmul.f32 %v622_v9, %v622_v9  ;;  %v631_v12 = vmul.f32 %v623_v13, %v623_v13 }
 0x2ed   : > { %v632_v5 = vadd.f32 %v625_v2, %v624_v1 }
 0x2ef   : > { %v633_v8 = vadd.f32 %v632_v5, %v626_v4 }
 0x2f1   : > { %v634_v11 = vadd.f32 %v633_v8, %v627_v7 }
 0x2f3   : > { %v635_v16 = vadd.f32 %v634_v11, %v628_v10 }
 0x2f5   : > { %v636_v18 = vadd.f32 %v635_v16, %v629_v15 }
 0x2f7   : > { %v637_v21 = vadd.f32 %v636_v18, %v630_v17 }
 0x2f9   : > { %v638_v22 = vadd.f32 %v637_v21, %v631_v12 }
 0x2fb   : > { %v639_v23 = vrot.slane %v638_v22, 4 }
 0x2fd   : > { %v640_v19 = vadd.f32 %v639_v23, %v638_v22 }
 0x2ff   : > { %v641_v24 = vrot.slane %v640_v19, 2 }
 0x301   : > { %v642_v20 = vadd.f32 %v641_v24, %v640_v19 }
 0x303   : > { %v643_v25 = vrot.slane %v642_v20, 1 }
 0x305   : > { %v644_v26 = vadd.f32 %v643_v25, %v642_v20 }
 0x307   : > { %v645_v27 = vmul.f32 0.015625, %v644_v26 }
 0x309   : > { %v646_v28 = vadd.f32 1e-05, %v645_v27 }
 0x30b   : > { %1108 = vrsqrt.f32 %v646_v28  ;;  %vm653_vm0 = vweird.f32 %v646_v28 }
 0x311   : > { %v1109_v29 = vpop.eup %1108 }
 0x312   : > { %v648_v30 = vmul.f32 %v1109_v29, %v646_v28  ;;  %vm654_vm15 = vweird.f32 %v1109_v29 }
 0x313   : > { %vm655_vm1 = vmor %vm653_vm0, %vm654_vm15 }
 0x314   : > { %v649_v31 = vmul.f32 %v1109_v29, %v648_v30 }
 0x316   : > { %v650_v32 = vmul.f32 0.5, %v649_v31 }
 0x318   : > { %v651_v33 = vsub.f32 1.5, %v650_v32 }
 0x31a   : > { %v652_v34 = vmul.f32 %v1109_v29, %v651_v33 }
 0x31c   : > { %v656_v36 = vsel %vm655_vm1, %v1109_v29, %v652_v34 }
 0x31d   : > { %v657_v37 = vmul.f32 %v656_v36, %v1239_v14 }
 0x31f   : > { %v658_v38 = vperm.slane %v657_v37, 7 }
 0x321   : > { %v659_v40 = vmul.f32 %v658_v38, %v616_v61  ;;  %v660_v42 = vmul.f32 %v658_v38, %v617_v62  ;;  %v661_v44 = vmul.f32 %v658_v38, %v618_v63  ;;  %v662_v46 = vmul.f32 %v658_v38, %v619_v0 }
 0x322   : > { %v663_v48 = vmul.f32 %v658_v38, %v620_v3  ;;  %v664_v50 = vmul.f32 %v658_v38, %v621_v6  ;;  %v665_v51 = vmul.f32 %v658_v38, %v622_v9  ;;  %v666_v53 = vmul.f32 %v658_v38, %v623_v13 }
 0x323   : > { %v668_v41 = vadd.f32 %v667_v39, %v659_v40  ;;  %v669_v43 = vadd.f32 %v667_v39, %v660_v42  ;;  %v670_v45 = vadd.f32 %v667_v39, %v661_v44  ;;  %v671_v47 = vadd.f32 %v667_v39, %v662_v46 }
 0x324   : > { %v672_v49 = vadd.f32 %v667_v39, %v663_v48  ;;  %v673_v14 = vadd.f32 %v667_v39, %v664_v50  ;;  %v674_v52 = vadd.f32 %v667_v39, %v665_v51  ;;  %v675_v54 = vadd.f32 %v667_v39, %v666_v53 }
 0x325   : > { %709 = vmatmul.f32.vlgmr.msra.gmra.mxu3 %v668_v41  ;;  %v692_v61 = vperm.slane %v1287_v35, 1 }
 0x32d   : > { %712 = vmatmul.f32.gmra.mxu3 %v669_v43 }
 0x335   : > { %715 = vmatmul.f32.gmra.mxu3 %v670_v45 }
 0x33d   : > { %718 = vmatmul.f32.gmra.mxu3 %v671_v47 }
 0x345   : > { %721 = vmatmul.f32.gmra.mxu3 %v672_v49 }
 0x34d   : > { %724 = vmatmul.f32.gmra.mxu3 %v673_v14 }
 0x355   : > { %727 = vmatmul.f32.gmra.mxu3 %v674_v52 }
 0x35d   : > { %730 = vmatmul.f32.gmra.mxu3 %v675_v54 }
 0x3a8   : > { %v710_v55 = vpop.f32.mrf.mxu3 }
 0x3a9   : > { %v711_v63 = vadd.f32 %v710_v55, %v692_v61 }
 0x3b0   : > { %v713_v56 = vpop.f32.mrf.mxu3 }
 0x3b1   : > { %v714_v62 = vadd.f32 %v713_v56, %v692_v61 }
 0x3b3   : > { %v734_v1 = vadd.f32 %v714_v62, %v711_v63 }
 0x3b8   : > { %v716_v57 = vpop.f32.mrf.mxu3 }
 0x3b9   : > { %v717_v0 = vadd.f32 %v716_v57, %v692_v61 }
 0x3bb   : > { %v735_v4 = vadd.f32 %v734_v1, %v717_v0 }
 0x3c0   : > { %v719_v58 = vpop.f32.mrf.mxu3 }
 0x3c1   : > { %v720_v2 = vadd.f32 %v719_v58, %v692_v61 }
 0x3c3   : > { %v736_v6 = vadd.f32 %v735_v4, %v720_v2 }
 0x3c8   : > { %v722_v59 = vpop.f32.mrf.mxu3 }
 0x3c9   : > { %v723_v5 = vadd.f32 %v722_v59, %v692_v61 }
 0x3cb   : > { %v737_v8 = vadd.f32 %v736_v6, %v723_v5 }
 0x3d0   : > { %v725_v60 = vpop.f32.mrf.mxu3 }
 0x3d1   : > { %v726_v7 = vadd.f32 %v725_v60, %v692_v61 }
 0x3d3   : > { %v738_v10 = vadd.f32 %v737_v8, %v726_v7 }
 0x3d8   : > { %v728_v3 = vpop.f32.mrf.mxu3 }
 0x3d9   : > { %v729_v9 = vadd.f32 %v728_v3, %v692_v61 }
 0x3db   : > { %v739_v13 = vadd.f32 %v738_v10, %v729_v9 }
 0x3e0   : > { %v731_v11 = vpop.f32.mrf.mxu3 }
 0x3e1   : > { %v732_v15 = vadd.f32 %v731_v11, %v692_v61 }
 0x3e3   : > { %v740_v16 = vadd.f32 %v739_v13, %v732_v15 }
 0x3e5   : > { %v741_v17 = vrot.slane %v740_v16, 4 }
 0x3e7   : > { %v742_v18 = vadd.f32 %v741_v17, %v740_v16 }
 0x3e9   : > { %v743_v12 = vrot.slane %v742_v18, 2 }
 0x3eb   : > { %v744_v21 = vadd.f32 %v743_v12, %v742_v18 }
 0x3ed   : > { %v745_v22 = vrot.slane %v744_v21, 1 }
 0x3ef   : > { %v746_v23 = vadd.f32 %v745_v22, %v744_v21 }
 0x3f1   : > { %v747_v19 = vmul.f32 0.015625, %v746_v23 }
 0x3f3   : > { %v748_v24 = vsub.f32 %v711_v63, %v747_v19  ;;  %v749_v20 = vsub.f32 %v714_v62, %v747_v19  ;;  %v750_v25 = vsub.f32 %v717_v0, %v747_v19  ;;  %v751_v26 = vsub.f32 %v720_v2, %v747_v19 }
 0x3f4   : > { %v752_v29 = vsub.f32 %v723_v5, %v747_v19  ;;  %v753_v32 = vsub.f32 %v726_v7, %v747_v19  ;;  %v754_v36 = vsub.f32 %v729_v9, %v747_v19  ;;  %v755_v39 = vsub.f32 %v732_v15, %v747_v19 }
 0x3f5   : > { %v756_v27 = vmul.f32 %v748_v24, %v748_v24  ;;  %v757_v28 = vmul.f32 %v749_v20, %v749_v20  ;;  %v758_v30 = vmul.f32 %v750_v25, %v750_v25  ;;  %v759_v33 = vmul.f32 %v751_v26, %v751_v26 }
 0x3f6   : > { %v760_v37 = vmul.f32 %v752_v29, %v752_v29  ;;  %v761_v40 = vmul.f32 %v753_v32, %v753_v32  ;;  %v762_v42 = vmul.f32 %v754_v36, %v754_v36  ;;  %v763_v44 = vmul.f32 %v755_v39, %v755_v39 }
 0x3f7   : > { %v764_v31 = vadd.f32 %v757_v28, %v756_v27  ;;  %v799_v63 = vperm.slane %v1287_v35, 3 }
 0x3f9   : > { %v765_v34 = vadd.f32 %v764_v31, %v758_v30 }
 0x3fb   : > { %v766_v38 = vadd.f32 %v765_v34, %v759_v33 }
 0x3fd   : > { %v767_v41 = vadd.f32 %v766_v38, %v760_v37 }
 0x3ff   : > { %v768_v43 = vadd.f32 %v767_v41, %v761_v40 }
 0x401   : > { %v769_v45 = vadd.f32 %v768_v43, %v762_v42 }
 0x403   : > { %v770_v46 = vadd.f32 %v769_v45, %v763_v44 }
 0x405   : > { %v771_v47 = vrot.slane %v770_v46, 4 }
 0x407   : > { %v772_v48 = vadd.f32 %v771_v47, %v770_v46 }
 0x409   : > { %v773_v49 = vrot.slane %v772_v48, 2 }
 0x40b   : > { %v774_v50 = vadd.f32 %v773_v49, %v772_v48 }
 0x40d   : > { %v775_v14 = vrot.slane %v774_v50, 1 }
 0x40f   : > { %v776_v51 = vadd.f32 %v775_v14, %v774_v50 }
 0x411   : > { %v777_v52 = vmul.f32 0.015625, %v776_v51 }
 0x413   : > { %v778_v53 = vadd.f32 1e-05, %v777_v52 }
 0x415   : > { %1110 = vrsqrt.f32 %v778_v53  ;;  %vm785_vm3 = vweird.f32 %v778_v53 }
 0x41b   : > { %v1111_v54 = vpop.eup %1110 }
 0x41c   : > { %v780_v55 = vmul.f32 %v1111_v54, %v778_v53  ;;  %vm786_vm2 = vweird.f32 %v1111_v54 }
 0x41d   : > { %vm787_vm4 = vmor %vm785_vm3, %vm786_vm2 }
 0x41e   : > { %v781_v56 = vmul.f32 %v1111_v54, %v780_v55 }
 0x420   : > { %v782_v57 = vmul.f32 0.5, %v781_v56 }
 0x422   : > { %v783_v58 = vsub.f32 1.5, %v782_v57 }
 0x424   : > { %v784_v59 = vmul.f32 %v1111_v54, %v783_v58 }
 0x426   : > { %v788_v60 = vsel %vm787_vm4, %v1111_v54, %v784_v59 }
 0x427   : > { %v789_v61 = vmul.f32 %v788_v60, %v1287_v35 }
 0x429   : > { %v790_v62 = vperm.slane %v789_v61, 2 }
 0x42b   : > { %v791_v0 = vmul.f32 %v790_v62, %v748_v24  ;;  %v792_v1 = vmul.f32 %v790_v62, %v749_v20  ;;  %v793_v2 = vmul.f32 %v790_v62, %v750_v25  ;;  %v794_v3 = vmul.f32 %v790_v62, %v751_v26 }
 0x42c   : > { %v795_v4 = vmul.f32 %v790_v62, %v752_v29  ;;  %v796_v5 = vmul.f32 %v790_v62, %v753_v32  ;;  %v797_v6 = vmul.f32 %v790_v62, %v754_v36  ;;  %v798_v18 = vmul.f32 %v790_v62, %v755_v39 }
 0x42d   : > { %v800_v7 = vadd.f32 %v799_v63, %v791_v0  ;;  %v801_v8 = vadd.f32 %v799_v63, %v792_v1  ;;  %v802_v9 = vadd.f32 %v799_v63, %v793_v2  ;;  %v803_v10 = vadd.f32 %v799_v63, %v794_v3 }
 0x42e   : > { %v804_v11 = vadd.f32 %v799_v63, %v795_v4  ;;  %v805_v13 = vadd.f32 %v799_v63, %v796_v5  ;;  %v806_v21 = vadd.f32 %v799_v63, %v797_v6  ;;  %v807_v23 = vadd.f32 %v799_v63, %v798_v18 }
 0x42f   : > { %v1055_v15 = vmul.f32 -1.442695, %v800_v7  ;;  %v1056_v16 = vmul.f32 -1.442695, %v801_v8  ;;  %v1057_v17 = vmul.f32 -1.442695, %v802_v9 }
 0x430   : > { %v1058_v12 = vmul.f32 -1.442695, %v803_v10  ;;  %v1059_v35 = vmul.f32 -1.442695, %v804_v11  ;;  %v1060_v22 = vmul.f32 -1.442695, %v805_v13 }
 0x431   : > { %1112 = vpow2.f32 %v1055_v15  ;;  %v1061_v19 = vmul.f32 -1.442695, %v806_v21  ;;  %v1062_v25 = vmul.f32 -1.442695, %v807_v23 }
 0x432   : > { %1114 = vpow2.f32 %v1056_v16 }
 0x433   : > { %1116 = vpow2.f32 %v1057_v17 }
 0x434   : > { %1118 = vpow2.f32 %v1058_v12 }
 0x435   : > { %1120 = vpow2.f32 %v1059_v35 }
 0x436   : > { %1122 = vpow2.f32 %v1060_v22 }
 0x437   : > { %v1113_v24 = vpop.eup %1112  ;;  %1124 = vpow2.f32 %v1061_v19 }
 0x438   : > { %v1115_v20 = vpop.eup %1114  ;;  %v1294_v26 = vadd.f32 1.0, %v1113_v24 }
 0x439   : > { %v1117_v27 = vpop.eup %1116  ;;  %v1296_v28 = vadd.f32 1.0, %v1115_v20 }
 0x43a   : > { %v1119_v29 = vpop.eup %1118  ;;  %v1298_v30 = vadd.f32 1.0, %v1117_v27  ;;  %1126 = vrcp.f32 %v1294_v26  ;;  %v851_v38 = vand.u32 2147483648, %v1294_v26  ;;  %vm845_vm5 = vweird.f32 %v1294_v26 }
 0x43b   : > { %v1121_v31 = vpop.eup %1120  ;;  %v1301_v32 = vadd.f32 1.0, %v1119_v29  ;;  %1128 = vrcp.f32 %v1296_v28  ;;  %v866_v42 = vand.u32 2147483648, %v1296_v28  ;;  %v849_v44 = vand.u32 2147483647, %v1294_v26 }
 0x43c   : > { %v1123_v33 = vpop.eup %1122  ;;  %1130 = vpow2.f32 %v1062_v25  ;;  %v1304_v34 = vadd.f32 1.0, %v1121_v31  ;;  %v864_v46 = vand.u32 2147483647, %v1296_v28  ;;  %v852_v49 = vor.u32 1.1754944e-38, %v851_v38 }
 0x43d   : > { %1132 = vrcp.f32 %v1298_v30  ;;  %v1125_v36 = vpop.eup %1124  ;;  %v1307_v37 = vadd.f32 1.0, %v1123_v33  ;;  %vm860_vm6 = vweird.f32 %v1296_v28  ;;  %v881_v50 = vand.u32 2147483648, %v1298_v30 }
 0x43e   : > { %1134 = vrcp.f32 %v1301_v32  ;;  %v1329_v14 = vadd.f32 1.0, %v1125_v36  ;;  %vm875_vm7 = vweird.f32 %v1298_v30  ;;  %v879_v53 = vand.u32 2147483647, %v1298_v30 }
 0x43f   : > { %1136 = vrcp.f32 %v1304_v34  ;;  %v867_v57 = vor.u32 1.1754944e-38, %v866_v42  ;;  %vm890_vm8 = vweird.f32 %v1301_v32  ;;  %vm1343_vm9 = vcmp.eq.f32.partialorder %v849_v44, 8.507059e+37 }
 0x440   : > { %v1311_v39 = vpop.eup %1126  ;;  %1138 = vrcp.f32 %v1307_v37  ;;  %v894_v63 = vand.u32 2147483647, %v1301_v32  ;;  %vm1352_vm11 = vcmp.eq.f32.partialorder %v864_v46, 8.507059e+37  ;;  %v882_v1 = vor.u32 1.1754944e-38, %v881_v50 }
 0x441   : > { %v1314_v40 = vpop.eup %1128  ;;  %v841_v41 = vmul.f32 %v1311_v39, %v1294_v26  ;;  %vm846_vm10 = vweird.f32 %v1311_v39  ;;  %v896_v2 = vand.u32 2147483648, %v1301_v32  ;;  %vm1361_vm12 = vcmp.eq.f32.partialorder %v879_v53, 8.507059e+37 }
 0x442   : > { %v1131_v43 = vpop.eup %1130  ;;  %v856_v45 = vmul.f32 %v1314_v40, %v1296_v28  ;;  %vm905_vm13 = vweird.f32 %v1304_v34  ;;  %vm861_vm14 = vweird.f32 %v1314_v40  ;;  %1140 = vrcp.f32 %v1329_v14  ;;  %vm1380_vm1 = vmor %vm845_vm5, %vm846_vm10 }
 0x443   : > { %v1324_v47 = vpop.eup %1132  ;;  %v842_v48 = vsub.f32 1.0, %v841_v41  ;;  %v1337_v55 = vadd.f32 1.0, %v1131_v43  ;;  %vm1372_vm0 = vcmp.eq.f32.partialorder %v894_v63, 8.507059e+37  ;;  %v897_v17 = vor.u32 1.1754944e-38, %v896_v2  ;;  %vm1392_vm3 = vmor %vm860_vm6, %vm861_vm14 }
 0x444   : > { %v857_v51 = vsub.f32 1.0, %v856_v45  ;;  %v871_v52 = vmul.f32 %v1324_v47, %v1298_v30  ;;  %v1335_v54 = vpop.eup %1134  ;;  %vm876_vm15 = vweird.f32 %v1324_v47  ;;  %v909_v23 = vand.u32 2147483647, %v1304_v34 }
 0x445   : > { %v843_v56 = vmul.f32 %v1311_v39, %v842_v48  ;;  %v1341_v58 = vpop.eup %1136  ;;  %v886_v62 = vmul.f32 %v1335_v54, %v1301_v32  ;;  %vm891_vm2 = vweird.f32 %v1335_v54  ;;  %vm1404_vm5 = vmor %vm875_vm7, %vm876_vm15  ;;  %v911_v25 = vand.u32 2147483648, %v1304_v34 }
 0x446   : > { %v858_v60 = vmul.f32 %v1314_v40, %v857_v51  ;;  %v872_v61 = vsub.f32 1.0, %v871_v52  ;;  %v901_v3 = vmul.f32 %v1341_v58, %v1304_v34  ;;  %v1139_v8 = vpop.eup %1138  ;;  %vm906_vm4 = vweird.f32 %v1341_v58  ;;  %vm1417_vm6 = vmor %vm890_vm8, %vm891_vm2 }
 0x447   : > { %v844_v4 = vadd.f32 %v1311_v39, %v843_v56  ;;  %v887_v7 = vsub.f32 1.0, %v886_v62  ;;  %v916_v12 = vmul.f32 %v1139_v8, %v1307_v37  ;;  %v924_v29 = vand.u32 2147483647, %v1307_v37  ;;  %vm1440_vm7 = vmor %vm905_vm13, %vm906_vm4 }
 0x448   : > { %v873_v5 = vmul.f32 %v1324_v47, %v872_v61  ;;  %v859_v9 = vadd.f32 %v1314_v40, %v858_v60  ;;  %v902_v10 = vsub.f32 1.0, %v901_v3  ;;  %v926_v30 = vand.u32 2147483648, %v1307_v37  ;;  %v1141_v31 = vpop.eup %1140 }
 0x449   : > { %v888_v13 = vmul.f32 %v1335_v54, %v887_v7  ;;  %v848_v21 = vsel %vm1380_vm1, %v1311_v39, %v844_v4  ;;  %v917_v26 = vsub.f32 1.0, %v916_v12  ;;  %1142 = vrcp.f32 %v1337_v55 }
 0x44a   : > { %v874_v11 = vadd.f32 %v1324_v47, %v873_v5  ;;  %v903_v18 = vmul.f32 %v1341_v58, %v902_v10  ;;  %v863_v19 = vsel %vm1392_vm3, %v1314_v40, %v859_v9  ;;  %v853_v32 = vsel %vm1343_vm9, %v852_v49, %v848_v21 }
 0x44b   : > { %v889_v22 = vadd.f32 %v1335_v54, %v888_v13  ;;  %v918_v38 = vmul.f32 %v1139_v8, %v917_v26  ;;  %vm921_vm8 = vweird.f32 %v1139_v8  ;;  %v868_v39 = vsel %vm1352_vm11, %v867_v57, %v863_v19 }
 0x44c   : > { %v904_v20 = vadd.f32 %v1341_v58, %v903_v18  ;;  %v878_v27 = vsel %vm1404_vm5, %v1324_v47, %v874_v11  ;;  %vm920_vm9 = vweird.f32 %v1307_v37  ;;  %v931_v41 = vmul.f32 %v1141_v31, %v1329_v14 }
 0x44d   : > { %v893_v33 = vsel %vm1417_vm6, %v1335_v54, %v889_v22  ;;  %v883_v34 = vsel %vm1361_vm12, %v882_v1, %v878_v27  ;;  %v912_v42 = vor.u32 1.1754944e-38, %v911_v25  ;;  %v919_v43 = vadd.f32 %v1139_v8, %v918_v38  ;;  %vm922_vm13 = vmor %vm920_vm9, %vm921_vm8 }
 0x44e   : > { %v908_v40 = vsel %vm1440_vm7, %v1341_v58, %v904_v20  ;;  %vm960_vm10 = vcmask 7168   ;;  %v898_v44 = vsel %vm1372_vm0, %v897_v17, %v893_v33  ;;  %vm910_vm11 = vcmp.eq.f32.partialorder %v909_v23, 8.507059e+37 }
 0x44f   : > { %v927_v45 = vor.u32 1.1754944e-38, %v926_v30  ;;  %v932_v46 = vsub.f32 1.0, %v931_v41  ;;  %961 = vst.msk [vmem:[%s1429_s4] sm:$0xff] %vm960_vm10, %v853_v32  ;;  %v913_v37 = vsel %vm910_vm11, %v912_v42, %v908_v40  ;;  %v923_v47 = vsel %vm922_vm13, %v1139_v8, %v919_v43  ;;  %v1143_v49 = vpop.eup %1142 }
 0x450   : > { %vm925_vm14 = vcmp.eq.f32.partialorder %v924_v29, 8.507059e+37  ;;  %v941_v48 = vand.u32 2147483648, %v1329_v14  ;;  %962 = vst.msk [vmem:[%s1429_s4 + $0x8] sm:$0xff] %vm960_vm10, %v868_v39  ;;  %vm936_vm12 = vweird.f32 %v1141_v31  ;;  %v939_v52 = vand.u32 2147483647, %v1329_v14 }
 0x451   : > { %v928_v50 = vsel %vm925_vm14, %v927_v45, %v923_v47  ;;  %v933_v51 = vmul.f32 %v1141_v31, %v932_v46  ;;  %963 = vst.msk [vmem:[%s1429_s4 + $0x10] sm:$0xff] %vm960_vm10, %v883_v34  ;;  %v946_v53 = vmul.f32 %v1143_v49, %v1337_v55  ;;  %vm935_vm15 = vweird.f32 %v1329_v14 }
 0x452   : > { %964 = vst.msk [vmem:[%s1429_s4 + $0x18] sm:$0xff] %vm960_vm10, %v898_v44  ;;  %vm937_vm0 = vmor %vm935_vm15, %vm936_vm12  ;;  %v942_v56 = vor.u32 1.1754944e-38, %v941_v48  ;;  %vm940_vm1 = vcmp.eq.f32.partialorder %v939_v52, 8.507059e+37  ;;  %v956_v59 = vand.u32 2147483648, %v1337_v55  ;;  %vm951_vm2 = vweird.f32 %v1143_v49 }
 0x453   : > { %v934_v54 = vadd.f32 %v1141_v31, %v933_v51  ;;  %965 = vst.msk [vmem:[%s1429_s4 + $0x20] sm:$0xff] %vm960_vm10, %v913_v37  ;;  %v947_v57 = vsub.f32 1.0, %v946_v53  ;;  %v954_v62 = vand.u32 2147483647, %v1337_v55  ;;  %vm950_vm3 = vweird.f32 %v1337_v55 }
 0x454   : > { %966 = vst.msk [vmem:[%s1429_s4 + $0x28] sm:$0xff] %vm960_vm10, %v928_v50  ;;  %vm952_vm4 = vmor %vm950_vm3, %vm951_vm2  ;;  %v957_v63 = vor.u32 1.1754944e-38, %v956_v59 }
 0x455   : > { %v938_v58 = vsel %vm937_vm0, %v1141_v31, %v934_v54  ;;  %v948_v61 = vmul.f32 %v1143_v49, %v947_v57  ;;  %vm955_vm5 = vcmp.eq.f32.partialorder %v954_v62, 8.507059e+37 }
 0x456   : > { %v943_v60 = vsel %vm940_vm1, %v942_v56, %v938_v58 }
 0x457   : > { %967 = vst.msk [vmem:[%s1429_s4 + $0x30] sm:$0xff] %vm960_vm10, %v943_v60  ;;  %v949_v14 = vadd.f32 %v1143_v49, %v948_v61 }
 0x459   : > { %v953_v0 = vsel %vm952_vm4, %v1143_v49, %v949_v14 }
 0x45a   : > { %v958_v1 = vsel %vm955_vm5, %v957_v63, %v953_v0 }
 0x45b   : > { %968 = vst.msk [vmem:[%s1429_s4 + $0x38] sm:$0xff] %vm960_vm10, %v958_v1 }
 0x45c PF: > { %s14_s12 = sadd.s32 1, %s1184_s12  }
 0x45d   : > { %p11_p7 = scmp.ge.s32.totalorder %s14_s12, 6  }
 0x45f   :  { %13 = sbr.rel (!%p11_p7) target bundleno = 1 (0x1), region = 67 }
 0x464   :  { %990 = vsyncpa [#allocation3], 1 }
 0x465   :  { %992 = vsyncpa [#allocation3 + $0x1], 1 }

</bundles_post_ra>
